<compile_context>
chip_gen: v7x
topology: tpu7x:2x2x1
jax: 0.10.0
libtpu: 0.0.40
codegen_flags: <defaults>
</compile_context>

<pallas_src>
import jax
import jax.numpy as jnp
from jax.experimental import pallas as pl
from jax.experimental.pallas import tpu as pltpu


def _round_up(x, m):
    return (x + m - 1) // m * m


def _simple_model_kernel(o_ref, w1_ref, b1_ref, wh_ref, bh_ref, out_ref):
    # fc1 on the MXU: K is zero-padded to 8 in prepare_params (padded columns
    # contribute exactly 0).  f32 operands keep h exact; bias + ReLU on the VPU.
    h = jnp.dot(o_ref[...], w1_ref[...], preferred_element_type=jnp.float32)
    h = jnp.maximum(h + b1_ref[...], 0.0)

    # Fused policy|value heads: a single lane-dense (TB, 128) MXU pass.
    # wh_ref is bf16 by default (MXU-native on v5e/v6e/v7x); accumulation f32.
    y = jnp.dot(h.astype(wh_ref.dtype), wh_ref[...],
                preferred_element_type=jnp.float32)

    # Store only the useful lanes (out_w = round_up(action_num + 1, 8)); the
    # HBM writeback is 8 lanes/row instead of a 128-wide, ~97%-padded slab.
    out_w = out_ref.shape[1]
    out_ref[...] = (y[:, :out_w] + bh_ref[...]).astype(out_ref.dtype)


def prepare_params(params, *, mxu_bf16=True):
    """One-time layout plumbing: fuse + zero-pad head weights, pad fc1's K to 8,
    optionally cast head weights to bf16.  Do NOT call this per forward pass."""
    input_dim, H = params["w1"].shape
    action_num = params["wp"].shape[1]
    n_heads = action_num + 1
    n_pad = _round_up(n_heads, 128)    # lane-dense MXU operand / VMEM result
    out_w = _round_up(n_heads, 8)      # narrow stored-output width
    k_pad = _round_up(input_dim, 8)    # fc1 reduction dim padded for the MXU

    w1 = jnp.zeros((k_pad, H), jnp.float32).at[:input_dim, :].set(params["w1"])
    b1 = params["b1"].reshape(1, H).astype(jnp.float32)

    wh = jnp.zeros((H, n_pad), jnp.float32)
    wh = wh.at[:, :action_num].set(params["wp"])
    wh = wh.at[:, action_num:n_heads].set(params["wv"])
    bh = jnp.zeros((1, out_w), jnp.float32)
    bh = bh.at[:, :action_num].set(params["bp"])
    bh = bh.at[:, action_num:n_heads].set(params["bv"])

    if mxu_bf16:
        # bf16 MXU operands for the big (K=512) head matmul; f32 accumulation
        # in-kernel.  fc1 stays f32 (tiny K), bias/ReLU stay f32 on the VPU.
        wh = wh.astype(jnp.bfloat16)

    return {"w1": w1, "b1": b1, "wh": wh, "bh": bh, "action_num": action_num}


def simple_model_forward(o, prepared, *, tb=512):
    """o: (B, input_dim) float32. prepared: output of prepare_params().

    Returns {'policy': (B, action_num), 'value': (B, 1)}.
    """
    B, input_dim = o.shape
    w1, b1, wh, bh = prepared["w1"], prepared["b1"], prepared["wh"], prepared["bh"]
    k_pad, H = w1.shape
    n_pad = wh.shape[1]
    out_w = bh.shape[1]
    action_num = prepared["action_num"]
    n_heads = action_num + 1

    # Pad observation feature dim to k_pad (zero columns contribute 0).
    o_p = o if input_dim == k_pad else jnp.pad(o, ((0, 0), (0, k_pad - input_dim)))

    # Balanced batch tiles (minimal last-tile padding), capped at tb rows, and
    # >= 2 grid steps when B >= 16 so v7x's two TensorCores both get work.
    num_tiles = pl.cdiv(B, tb)
    if B >= 16:
        num_tiles = max(num_tiles, 2)
    tb_eff = _round_up(pl.cdiv(B, num_tiles), 8)
    Bp = tb_eff * pl.cdiv(B, tb_eff)
    if Bp != B:
        o_p = jnp.pad(o_p, ((0, Bp - B), (0, 0)))
    grid = (Bp // tb_eff,)

    # Per-step VMEM (o tile + narrow out tile + h temp + resident weights) is a
    # few hundred KiB even at tb=1024 -- far below the scoped defaults on
    # v5e/v6e/v7x, so no vmem_limit override is needed.

    flops = 2 * Bp * (k_pad * H + H * n_pad)
    bytes_accessed = int(
        o_p.size * o_p.dtype.itemsize
        + w1.size * w1.dtype.itemsize + b1.size * 4
        + wh.size * wh.dtype.itemsize + bh.size * 4
        + Bp * out_w * 4)

    out = pl.pallas_call(
        _simple_model_kernel,
        out_shape=jax.ShapeDtypeStruct((Bp, out_w), jnp.float32),
        grid_spec=pltpu.PrefetchScalarGridSpec(
            num_scalar_prefetch=0,
            grid=grid,
            in_specs=[
                pl.BlockSpec((tb_eff, k_pad), lambda i: (i, 0)),   # o tile
                pl.BlockSpec((k_pad, H), lambda i: (0, 0)),        # fc1 W (resident)
                pl.BlockSpec((1, H), lambda i: (0, 0)),            # fc1 b (resident)
                pl.BlockSpec((H, n_pad), lambda i: (0, 0)),        # fused heads W
                pl.BlockSpec((1, out_w), lambda i: (0, 0)),        # fused heads b
            ],
            out_specs=pl.BlockSpec((tb_eff, out_w), lambda i: (i, 0)),
        ),
        compiler_params=pltpu.CompilerParams(
            dimension_semantics=("parallel",),   # batch axis -> v7x megacore
        ),
        cost_estimate=pl.CostEstimate(
            flops=flops, transcendentals=0, bytes_accessed=bytes_accessed),
    )(o_p, w1, b1, wh, bh)

    p = out[:B, :action_num]
    v = out[:B, action_num:n_heads]
    return {"policy": p, "value": v}


def init_params(key, input_dim, nn_size, action_num):
    """Deterministic synthetic parameters (shapes match the nn.Linear layers)."""
    k1, k2, k3, k4, k5, k6 = jax.random.split(key, 6)
    # Stored as (in, out) -- transpose of PyTorch's (out, in) weight layout.
    w1 = jax.random.normal(k1, (input_dim, nn_size), jnp.float32) * 0.1
    b1 = jax.random.normal(k2, (1, nn_size), jnp.float32) * 0.01
    wp = jax.random.normal(k3, (nn_size, action_num), jnp.float32) * 0.1
    bp = jax.random.normal(k4, (1, action_num), jnp.float32) * 0.01
    wv = jax.random.normal(k5, (nn_size, 1), jnp.float32) * 0.1
    bv = jax.random.normal(k6, (1, 1), jnp.float32) * 0.01
    return {"w1": w1, "b1": b1, "wp": wp, "bp": bp, "wv": wv, "bv": bv}


def reference_forward(o, params):
    """Pure-JAX reference for correctness check."""
    h = jnp.maximum(o @ params["w1"] + params["b1"], 0.0)
    p = h @ params["wp"] + params["bp"]
    v = h @ params["wv"] + params["bv"]
    return {"policy": p, "value": v}


if __name__ == "__main__":
    key = jax.random.PRNGKey(0)
    k_obs, k_params, k_big = jax.random.split(key, 3)

    # CartPole-like sizes: obs dim 4, 2 actions, hidden 512 (as in the module).
    B, input_dim, nn_size, action_num = 8, 4, 512, 2
    params = init_params(k_params, input_dim, nn_size, action_num)

    prepared_f32 = prepare_params(params, mxu_bf16=False)
    prepared_bf16 = prepare_params(params, mxu_bf16=True)   # default config

    # Small batch (single grid step), exact f32 path -> tight tolerance.
    o = jax.random.normal(k_obs, (B, input_dim), jnp.float32)
    ref = reference_forward(o, params)
    out = simple_model_forward(o, prepared_f32)
    jax.block_until_ready(out)
    assert out["policy"].shape == (B, action_num)
    assert out["value"].shape == (B, 1)
    assert jnp.allclose(out["policy"], ref["policy"], atol=1e-4, rtol=1e-4)
    assert jnp.allclose(out["value"], ref["value"], atol=1e-4, rtol=1e-4)

    # Default bf16-heads path: bf16 operand rounding over a K=512 reduction, so
    # use a correspondingly looser tolerance.
    out_bf16 = simple_model_forward(o, prepared_bf16)
    jax.block_until_ready(out_bf16)
    assert jnp.allclose(out_bf16["policy"], ref["policy"], atol=2e-2, rtol=2e-2)
    assert jnp.allclose(out_bf16["value"], ref["value"], atol=2e-2, rtol=2e-2)

    # Larger, non-tile-multiple batch: exercises balanced tiling (2 grid steps,
    # 152 rows each for B=300), batch padding, and the 8-lane output writeback.
    B_big = 300
    o_big = jax.random.normal(k_big, (B_big, input_dim), jnp.float32)
    ref_big = reference_forward(o_big, params)
    out_big = simple_model_forward(o_big, prepared_bf16, tb=512)
    jax.block_until_ready(out_big)
    assert out_big["policy"].shape == (B_big, action_num)
    assert out_big["value"].shape == (B_big, 1)
    assert jnp.allclose(out_big["policy"], ref_big["policy"], atol=2e-2, rtol=2e-2)
    assert jnp.allclose(out_big["value"], ref_big["value"], atol=2e-2, rtol=2e-2)

    print("KERNEL_OK")
</pallas_src>

<mosaic_0001>
module attributes {stable_mosaic.version = 11 : i64} {
  func.func @_simple_model_kernel(%arg0: i32, %arg1: memref<8x8xf32, #tpu.memory_space<vmem>>, %arg2: memref<8x512xf32, #tpu.memory_space<vmem>>, %arg3: memref<1x512xf32, #tpu.memory_space<vmem>>, %arg4: memref<512x128xf32, #tpu.memory_space<vmem>>, %arg5: memref<1x8xf32, #tpu.memory_space<vmem>>, %arg6: memref<8x8xf32, #tpu.memory_space<vmem>>) attributes {dimension_semantics = [#tpu.dimension_semantics<parallel>], iteration_bounds = array<i64: 1>, scalar_prefetch = 0 : i64, scratch_operands = 0 : i64, tpu.core_type = #tpu.core_type<tc>, window_params = [{transform_indices = @transform_0, window_bounds = array<i64: 8, 8>}, {pipeline_mode = #tpu.pipeline_mode<synchronous>, transform_indices = @transform_1, window_bounds = array<i64: 8, 512>}, {pipeline_mode = #tpu.pipeline_mode<synchronous>, transform_indices = @transform_2, window_bounds = array<i64: 1, 512>}, {pipeline_mode = #tpu.pipeline_mode<synchronous>, transform_indices = @transform_3, window_bounds = array<i64: 512, 128>}, {pipeline_mode = #tpu.pipeline_mode<synchronous>, transform_indices = @transform_4, window_bounds = array<i64: 1, 8>}, {transform_indices = @transform_5, window_bounds = array<i64: 8, 8>}]} {
    %c0 = arith.constant 0 : index
    %c0_0 = arith.constant 0 : index
    %0 = vector.load %arg1[%c0, %c0_0] : memref<8x8xf32, #tpu.memory_space<vmem>>, vector<8x8xf32>
    %c0_1 = arith.constant 0 : index
    %c0_2 = arith.constant 0 : index
    %1 = vector.load %arg2[%c0_1, %c0_2] : memref<8x512xf32, #tpu.memory_space<vmem>>, vector<8x512xf32>
    %cst = arith.constant dense<0.000000e+00> : vector<8x512xf32>
    %2 = tpu.matmul %0, %1, %cst {dimension_numbers = #tpu.dot_dimension_numbers<[1], [0], [0], [1], [0, 0, 1, 1], [], []>} : vector<8x8xf32>, vector<8x512xf32>, vector<8x512xf32> -> vector<8x512xf32>
    %c0_3 = arith.constant 0 : index
    %c0_4 = arith.constant 0 : index
    %3 = vector.load %arg3[%c0_3, %c0_4] : memref<1x512xf32, #tpu.memory_space<vmem>>, vector<1x512xf32>
    %4 = vector.broadcast %3 : vector<1x512xf32> to vector<8x512xf32>
    %5 = arith.addf %2, %4 : vector<8x512xf32>
    %cst_5 = arith.constant 0.000000e+00 : f32
    %6 = vector.broadcast %cst_5 : f32 to vector<8x512xf32>
    %7 = arith.maximumf %5, %6 : vector<8x512xf32>
    %c0_6 = arith.constant 0 : index
    %c0_7 = arith.constant 0 : index
    %8 = vector.load %arg4[%c0_6, %c0_7] : memref<512x128xf32, #tpu.memory_space<vmem>>, vector<512x128xf32>
    %cst_8 = arith.constant dense<0.000000e+00> : vector<8x128xf32>
    %9 = tpu.matmul %7, %8, %cst_8 {dimension_numbers = #tpu.dot_dimension_numbers<[1], [0], [0], [1], [0, 0, 1, 1], [], []>} : vector<8x512xf32>, vector<512x128xf32>, vector<8x128xf32> -> vector<8x128xf32>
    %10 = vector.extract_strided_slice %9 {offsets = [0, 0], sizes = [8, 8], strides = [1, 1]} : vector<8x128xf32> to vector<8x8xf32>
    %c0_9 = arith.constant 0 : index
    %c0_10 = arith.constant 0 : index
    %11 = vector.load %arg5[%c0_9, %c0_10] : memref<1x8xf32, #tpu.memory_space<vmem>>, vector<1x8xf32>
    %12 = vector.broadcast %11 : vector<1x8xf32> to vector<8x8xf32>
    %13 = arith.addf %10, %12 : vector<8x8xf32>
    %c0_11 = arith.constant 0 : index
    %c0_12 = arith.constant 0 : index
    %14 = vector.load %arg6[%c0_11, %c0_12] : memref<8x8xf32, #tpu.memory_space<vmem>>, vector<8x8xf32>
    tpu.vector_store %arg6[%c0_11, %c0_12], %13 {strides = array<i32>} : memref<8x8xf32, #tpu.memory_space<vmem>>, vector<8x8xf32>,
    return
  }
  func.func @transform_0(%arg0: i32) -> (i32, i32) {
    %c0_i32 = arith.constant 0 : i32
    %c0_i32_0 = arith.constant 0 : i32
    return %arg0, %c0_i32 : i32, i32
  }
  func.func @transform_1(%arg0: i32) -> (i32, i32) {
    %c0_i32 = arith.constant 0 : i32
    %c0_i32_0 = arith.constant 0 : i32
    %c0_i32_1 = arith.constant 0 : i32
    return %c0_i32, %c0_i32_0 : i32, i32
  }
  func.func @transform_2(%arg0: i32) -> (i32, i32) {
    %c0_i32 = arith.constant 0 : i32
    %c0_i32_0 = arith.constant 0 : i32
    %c0_i32_1 = arith.constant 0 : i32
    return %c0_i32, %c0_i32_0 : i32, i32
  }
  func.func @transform_3(%arg0: i32) -> (i32, i32) {
    %c0_i32 = arith.constant 0 : i32
    %c0_i32_0 = arith.constant 0 : i32
    %c0_i32_1 = arith.constant 0 : i32
    return %c0_i32, %c0_i32_0 : i32, i32
  }
  func.func @transform_4(%arg0: i32) -> (i32, i32) {
    %c0_i32 = arith.constant 0 : i32
    %c0_i32_0 = arith.constant 0 : i32
    %c0_i32_1 = arith.constant 0 : i32
    return %c0_i32, %c0_i32_0 : i32, i32
  }
  func.func @transform_5(%arg0: i32) -> (i32, i32) {
    %c0_i32 = arith.constant 0 : i32
    %c0_i32_0 = arith.constant 0 : i32
    return %arg0, %c0_i32 : i32, i32
  }
}

</mosaic_0001>

<bundles_post_ra>
// kernel: tpu_custom_call.1
= control target key start
LH: loop header
LB: loop body
LE: loop exit
PB: predicated region body
PF: predicated region fallthrough
CT: control target
= control target key end

     0   :  { %10 = vsyncpa [#allocation3], 0  ;;  %s796_s0 = inlined_call_operand.hbm [shape: f32[8,8], index: 0, kind: input, shape index: {}]   ;;  %s797_s1 = inlined_call_operand.hbm [shape: f32[8,512], index: 1, kind: input, shape index: {}]   ;;  %s798_s2 = inlined_call_operand.vmem [shape: f32[1,512], index: 2, kind: input, shape index: {}]   ;;  %s799_s3 = inlined_call_operand.hbm [shape: f32[512,128], index: 3, kind: input, shape index: {}]   ;;  %s800_s4 = inlined_call_operand.vmem [shape: f32[1,8], index: 4, kind: input, shape index: {}]   ;;  %s801_s5 = inlined_call_operand.hbm [shape: f32[8,8], index: 5, kind: output, shape index: {}]  }
   0x1   :  { %11 = vsyncpa [#allocation6], 0 }
   0x2   :  { %12 = vsyncpa [#allocation4], 0  ;;  %s702_s18 = smov [#allocation5]   ;;  %s703_s20 = smov [#allocation2]  }
   0x3   :  { %s29_s19 = sshll.u32 %s702_s18, 4  ;;  %s19_s21 = sshll.u32 %s703_s20, 4  ;;  %s30_s19 = int_to_ptr.vmem [resolvable:$true] %s29_s19  ;;  %s20_s21 = int_to_ptr.vmem [resolvable:$true] %s19_s21 }
   0x4   :  { %s608_s24 = scalar_lea.hbm %s797_s1, 512 }
   0x5   :  { %p609_p0 = scmp.ne.s32.totalorder %s797_s1, %s608_s24  ;;  %p612_p1 = scmp.lt.u32.totalorder %s608_s24, %s797_s1 }
   0x7   :  { %p614_p2 = pnand %p612_p1, %p609_p0 }
   0x9   :  { %617 = shalt.err (!%p614_p2)
}
   0xa   :  { %s618_s29 = scalar_lea.vmem %s30_s19, 512  ;;  %p623_p4 = scmp.lt.s32.totalorder %s30_s19, %s30_s19 }
   0xb   :  { %p619_p3 = scmp.ne.s32.totalorder %s30_s19, %s618_s29  ;;  %p624_p5 = scmp.lt.s32.totalorder %s618_s29, %s618_s29 }
   0xd   :  { %p625_p6 = por %p624_p5, %p623_p4 }
   0xf   :  { %p626_p7 = pnand %p625_p6, %p619_p3 }
  0x11   :  { %629 = shalt.err (!%p626_p7)
}
  0x12   :  { %32 = dma.hbm_to_vmem [thread:$0]  %s797_s1, 512, %s30_s19, [#allocation6]  }
  0x13   :  { %s630_s9 = scalar_lea.hbm %s796_s0, 128 }
  0x14   :  { %p631_p8 = scmp.ne.s32.totalorder %s796_s0, %s630_s9  ;;  %p634_p9 = scmp.lt.u32.totalorder %s630_s9, %s796_s0 }
  0x16   :  { %p636_p10 = pnand %p634_p9, %p631_p8 }
  0x18   :  { %639 = shalt.err (!%p636_p10)
}
  0x19   :  { %s640_s14 = scalar_lea.vmem %s20_s21, 128  ;;  %p645_p12 = scmp.lt.s32.totalorder %s20_s21, %s20_s21 }
  0x1a   :  { %p641_p11 = scmp.ne.s32.totalorder %s20_s21, %s640_s14  ;;  %p646_p13 = scmp.lt.s32.totalorder %s640_s14, %s640_s14 }
  0x1c   :  { %p647_p0 = por %p646_p13, %p645_p12 }
  0x1e   :  { %p648_p1 = pnand %p647_p0, %p641_p11 }
  0x20   :  { %651 = shalt.err (!%p648_p1)
}
  0x21   :  { %22 = dma.hbm_to_vmem [thread:$0]  %s796_s0, 128, %s20_s21, [#allocation3]  }
  0x22   :  { %s704_s16 = smov [#allocation7]   ;;  %s652_s20 = scalar_lea.hbm %s799_s3, 8192 }
  0x23   :  { %s40_s17 = sshll.u32 %s704_s16, 4  ;;  %p653_p2 = scmp.ne.s32.totalorder %s799_s3, %s652_s20  ;;  %s41_s17 = int_to_ptr.vmem [resolvable:$true] %s40_s17 }
  0x24   :  { %p656_p3 = scmp.lt.u32.totalorder %s652_s20, %s799_s3 }
  0x26   :  { %p658_p4 = pnand %p656_p3, %p653_p2 }
  0x28   :  { %661 = shalt.err (!%p658_p4)
}
  0x29   :  { %s662_s26 = scalar_lea.vmem %s41_s17, 8192  ;;  %p667_p6 = scmp.lt.s32.totalorder %s41_s17, %s41_s17 }
  0x2a   :  { %p663_p5 = scmp.ne.s32.totalorder %s41_s17, %s662_s26  ;;  %p668_p7 = scmp.lt.s32.totalorder %s662_s26, %s662_s26 }
  0x2c   :  { %p669_p8 = por %p668_p7, %p667_p6 }
  0x2e   :  { %p670_p9 = pnand %p669_p8, %p663_p5 }
  0x30   :  { %673 = shalt.err (!%p670_p9)
}
  0x31   :  { %s705_s0 = smov 128   ;;  %s706_s21 = smov 8  }
  0x32   :  { %46 = dma.hbm_to_vmem [thread:$0]  %s799_s3, 8192, %s41_s17, [#allocation6], %s705_s0, %s705_s0, %s706_s21  }
  0x33   :  { %696 = dma.done.wait [#allocation3], 128  }
  0x34   :  { %697 = vsyncadd [#allocation3], 4294967168 }
  0x35   :  { %698 = dma.done.wait [#allocation6], 8704  }
  0x36   :  { %699 = vsyncadd [#allocation6], 4294958592  ;;  %v707_v0 = vmov 0.0   ;;  %v60_v1 = vld [vmem:[#allocation5 + $0x8] sm:$0xff]  ;;  %v62_v2 = vld [vmem:[#allocation5 + $0x18] sm:$0xff]  ;;  %vm85_vm0 = vcmask 64512  }
  0x37   :  { %153 = vmatprep.mubr.f32.mxu0 %v707_v0  ;;  %224 = vmatprep.mubr.f32.mxu1 %v707_v0  ;;  %v59_v3 = vld [vmem:[#allocation5] sm:$0xff]  ;;  %v61_v4 = vld [vmem:[#allocation5 + $0x10] sm:$0xff]  ;;  %v58_v5 = vld [vmem:[#allocation2] sm:$0xff]  ;;  %s708_s6 = smov [#allocation8]  }
  0x38   :  { %89 = vmatprep.subr.mxu0 %v60_v1  ;;  %160 = vmatprep.subr.mxu1 %v62_v2  ;;  %v251_v6 = vld [vmem:[#allocation7 + $0x80] sm:$0xff]  ;;  %v252_v7 = vld [vmem:[#allocation7 + $0x88] sm:$0xff]  ;;  %v253_v17 = vld [vmem:[#allocation7 + $0x90] sm:$0xff]  ;;  %s454_s7 = sshll.u32 %s708_s6, 4  ;;  %s455_s7 = int_to_ptr.vmem [resolvable:$true] %s454_s7 }
  0x39   :  { %90 = vmatpush1.msra.mxu0 %v59_v3  ;;  %161 = vmatpush1.msra.mxu1 %v61_v4  ;;  %v283_v8 = vld [vmem:[#allocation7 + $0x180] sm:$0xff]  ;;  %v284_v9 = vld [vmem:[#allocation7 + $0x188] sm:$0xff]  ;;  %v537_v10 = vpack.c.bf16 %v252_v7, %v251_v6  ;;  %v254_v18 = vld [vmem:[#allocation7 + $0x98] sm:$0xff]  ;;  %s674_s8 = scalar_lea.vmem %s455_s7, 128  ;;  %p679_p11 = scmp.lt.s32.totalorder %s455_s7, %s455_s7 }
  0x3a   :  { %464 = vmatmul.mubr.msk.f32.vlgmr.msra.gmra.mrb[0].mxu0 %vm85_vm0, %v58_v5  ;;  %465 = vmatmul.mubr.msk.f32.vlgmr.msra.gmra.mrb[0].mxu1 %vm85_vm0, %v58_v5  ;;  %v569_v11 = vpack.c.bf16 %v284_v9, %v283_v8  ;;  %v235_v12 = vld [vmem:[#allocation7] sm:$0xff]  ;;  %v236_v13 = vld [vmem:[#allocation7 + $0x8] sm:$0xff]  ;;  %v541_v20 = vpack.c.bf16 %v254_v18, %v253_v17  ;;  %v285_v21 = vld [vmem:[#allocation7 + $0x190] sm:$0xff]  ;;  %p675_p10 = scmp.ne.s32.totalorder %s455_s7, %s674_s8  ;;  %p680_p12 = scmp.lt.s32.totalorder %s674_s8, %s674_s8 }
  0x3b   :  { %v267_v14 = vld [vmem:[#allocation7 + $0x100] sm:$0xff]  ;;  %v539_v15 = vpack.c.bf16 %v236_v13, %v235_v12  ;;  %v268_v16 = vld [vmem:[#allocation7 + $0x108] sm:$0xff]  ;;  %538 = vmatprep.subr.bf16.mxu0 %v537_v10  ;;  %v286_v22 = vld [vmem:[#allocation7 + $0x198] sm:$0xff] }
  0x3c   :  { %570 = vmatprep.subr.bf16.mxu1 %v569_v11  ;;  %v571_v19 = vpack.c.bf16 %v268_v16, %v267_v14  ;;  %v237_v23 = vld [vmem:[#allocation7 + $0x10] sm:$0xff]  ;;  %v573_v24 = vpack.c.bf16 %v286_v22, %v285_v21  ;;  %v238_v25 = vld [vmem:[#allocation7 + $0x18] sm:$0xff]  ;;  %v255_v30 = vld [vmem:[#allocation7 + $0xa0] sm:$0xff]  ;;  %p681_p13 = por %p680_p12, %p679_p11 }
  0x3d   :  { %540 = vmatpush3.bf16.msra.mxu0 %v539_v15  ;;  %v269_v26 = vld [vmem:[#allocation7 + $0x110] sm:$0xff]  ;;  %v270_v27 = vld [vmem:[#allocation7 + $0x118] sm:$0xff]  ;;  %v543_v28 = vpack.c.bf16 %v238_v25, %v237_v23  ;;  %v256_v31 = vld [vmem:[#allocation7 + $0xa8] sm:$0xff] }
  0x3e   :  { %572 = vmatpush3.bf16.msra.mxu1 %v571_v19  ;;  %542 = vmatprep.subr.bf16.mxu0 %v541_v20  ;;  %v575_v29 = vpack.c.bf16 %v270_v27, %v269_v26  ;;  %v287_v32 = vld [vmem:[#allocation7 + $0x1a0] sm:$0xff]  ;;  %v545_v33 = vpack.c.bf16 %v256_v31, %v255_v30  ;;  %v288_v34 = vld [vmem:[#allocation7 + $0x1a8] sm:$0xff]  ;;  %v257_v40 = vld [vmem:[#allocation7 + $0xb0] sm:$0xff]  ;;  %p682_p0 = pnand %p681_p13, %p675_p10 }
  0x3f   :  { %574 = vmatprep.subr.bf16.mxu1 %v573_v24  ;;  %v239_v35 = vld [vmem:[#allocation7 + $0x20] sm:$0xff]  ;;  %v240_v36 = vld [vmem:[#allocation7 + $0x28] sm:$0xff]  ;;  %v577_v37 = vpack.c.bf16 %v288_v34, %v287_v32  ;;  %v258_v42 = vld [vmem:[#allocation7 + $0xb8] sm:$0xff] }
  0x40   :  { %v271_v38 = vld [vmem:[#allocation7 + $0x120] sm:$0xff]  ;;  %v272_v39 = vld [vmem:[#allocation7 + $0x128] sm:$0xff]  ;;  %v547_v41 = vpack.c.bf16 %v240_v36, %v239_v35  ;;  %v289_v43 = vld [vmem:[#allocation7 + $0x1b0] sm:$0xff]  ;;  %v549_v46 = vpack.c.bf16 %v258_v42, %v257_v40 }
  0x41   :  { %544 = vmatpush3.bf16.msra.mxu0 %v543_v28  ;;  %v290_v44 = vld [vmem:[#allocation7 + $0x1b8] sm:$0xff]  ;;  %v579_v45 = vpack.c.bf16 %v272_v39, %v271_v38  ;;  %v241_v47 = vld [vmem:[#allocation7 + $0x30] sm:$0xff]  ;;  %v259_v52 = vld [vmem:[#allocation7 + $0xc0] sm:$0xff]  ;;  %v65_v38 = vlaneseq }
  0x42   :  { %576 = vmatpush3.bf16.msra.mxu1 %v575_v29  ;;  %546 = vmatprep.subr.bf16.mxu0 %v545_v33  ;;  %v242_v48 = vld [vmem:[#allocation7 + $0x38] sm:$0xff]  ;;  %v273_v49 = vld [vmem:[#allocation7 + $0x130] sm:$0xff]  ;;  %v581_v50 = vpack.c.bf16 %v290_v44, %v289_v43  ;;  %v260_v53 = vld [vmem:[#allocation7 + $0xc8] sm:$0xff] }
  0x43   :  { %578 = vmatprep.subr.bf16.mxu1 %v577_v37  ;;  %v274_v51 = vld [vmem:[#allocation7 + $0x138] sm:$0xff]  ;;  %v291_v54 = vld [vmem:[#allocation7 + $0x1c0] sm:$0xff]  ;;  %v292_v55 = vld [vmem:[#allocation7 + $0x1c8] sm:$0xff]  ;;  %v551_v56 = vpack.c.bf16 %v242_v48, %v241_v47  ;;  %v553_v58 = vpack.c.bf16 %v260_v53, %v259_v52  ;;  %v66_v39 = vshrl.u32 %v65_v38, 7 }
  0x44   :  { %v583_v57 = vpack.c.bf16 %v274_v51, %v273_v49  ;;  %v243_v59 = vld [vmem:[#allocation7 + $0x40] sm:$0xff]  ;;  %v244_v60 = vld [vmem:[#allocation7 + $0x48] sm:$0xff]  ;;  %v585_v62 = vpack.c.bf16 %v292_v55, %v291_v54  ;;  %v261_v0 = vld [vmem:[#allocation7 + $0xd0] sm:$0xff] }
  0x45   :  { %548 = vmatpush3.bf16.msra.mxu0 %v547_v41  ;;  %v275_v61 = vld [vmem:[#allocation7 + $0x140] sm:$0xff]  ;;  %v276_v63 = vld [vmem:[#allocation7 + $0x148] sm:$0xff]  ;;  %v262_v1 = vld [vmem:[#allocation7 + $0xd8] sm:$0xff]  ;;  %v555_v4 = vpack.c.bf16 %v244_v60, %v243_v59  ;;  %v67_v40 = vsub.s32 0, %v66_v39  ;;  %v75_v41 = vsub.s32 2, %v66_v39  ;;  %v71_v43 = vsub.s32 1, %v66_v39 }
  0x46   :  { %580 = vmatpush3.bf16.msra.mxu1 %v579_v45  ;;  %550 = vmatprep.subr.bf16.mxu0 %v549_v46  ;;  %v293_v2 = vld [vmem:[#allocation7 + $0x1d0] sm:$0xff]  ;;  %v294_v3 = vld [vmem:[#allocation7 + $0x1d8] sm:$0xff]  ;;  %v587_v5 = vpack.c.bf16 %v276_v63, %v275_v61  ;;  %v557_v6 = vpack.c.bf16 %v262_v1, %v261_v0  ;;  %v263_v12 = vld [vmem:[#allocation7 + $0xe0] sm:$0xff]  ;;  %v79_v44 = vsub.s32 3, %v66_v39 }
  0x47   :  { %582 = vmatprep.subr.bf16.mxu1 %v581_v50  ;;  %v245_v7 = vld [vmem:[#allocation7 + $0x50] sm:$0xff]  ;;  %v246_v8 = vld [vmem:[#allocation7 + $0x58] sm:$0xff]  ;;  %v589_v10 = vpack.c.bf16 %v294_v3, %v293_v2  ;;  %v264_v13 = vld [vmem:[#allocation7 + $0xe8] sm:$0xff] }
  0x48   :  { %v277_v9 = vld [vmem:[#allocation7 + $0x150] sm:$0xff]  ;;  %v278_v11 = vld [vmem:[#allocation7 + $0x158] sm:$0xff]  ;;  %v295_v14 = vld [vmem:[#allocation7 + $0x1e0] sm:$0xff]  ;;  %v559_v16 = vpack.c.bf16 %v246_v8, %v245_v7  ;;  %v561_v18 = vpack.c.bf16 %v264_v13, %v263_v12 }
  0x49   :  { %552 = vmatpush3.bf16.msra.mxu0 %v551_v56  ;;  %v296_v15 = vld [vmem:[#allocation7 + $0x1e8] sm:$0xff]  ;;  %v591_v17 = vpack.c.bf16 %v278_v11, %v277_v9  ;;  %v247_v20 = vld [vmem:[#allocation7 + $0x60] sm:$0xff]  ;;  %v265_v26 = vld [vmem:[#allocation7 + $0xf0] sm:$0xff] }
  0x4a   :  { %584 = vmatpush3.bf16.msra.mxu1 %v583_v57  ;;  %554 = vmatprep.subr.bf16.mxu0 %v553_v58  ;;  %v593_v19 = vpack.c.bf16 %v296_v15, %v295_v14  ;;  %v248_v21 = vld [vmem:[#allocation7 + $0x68] sm:$0xff]  ;;  %v279_v22 = vld [vmem:[#allocation7 + $0x160] sm:$0xff]  ;;  %v266_v27 = vld [vmem:[#allocation7 + $0xf8] sm:$0xff] }
  0x4b   :  { %586 = vmatprep.subr.bf16.mxu1 %v585_v62  ;;  %v563_v23 = vpack.c.bf16 %v248_v21, %v247_v20  ;;  %v280_v24 = vld [vmem:[#allocation7 + $0x168] sm:$0xff]  ;;  %v297_v28 = vld [vmem:[#allocation7 + $0x1f0] sm:$0xff]  ;;  %v565_v29 = vpack.c.bf16 %v266_v27, %v265_v26  ;;  %v298_v30 = vld [vmem:[#allocation7 + $0x1f8] sm:$0xff] }
  0x4c   :  { %v595_v25 = vpack.c.bf16 %v280_v24, %v279_v22  ;;  %v249_v31 = vld [vmem:[#allocation7 + $0x70] sm:$0xff]  ;;  %v250_v32 = vld [vmem:[#allocation7 + $0x78] sm:$0xff]  ;;  %v597_v33 = vpack.c.bf16 %v298_v30, %v297_v28 }
  0x4d   :  { %556 = vmatpush3.bf16.msra.mxu0 %v555_v4  ;;  %v567_v34 = vpack.c.bf16 %v250_v32, %v249_v31  ;;  %v281_v35 = vld [vmem:[#allocation7 + $0x170] sm:$0xff]  ;;  %v282_v36 = vld [vmem:[#allocation7 + $0x178] sm:$0xff] }
  0x4e   :  { %588 = vmatpush3.bf16.msra.mxu1 %v587_v5  ;;  %558 = vmatprep.subr.bf16.mxu0 %v557_v6  ;;  %v599_v37 = vpack.c.bf16 %v282_v36, %v281_v35  ;;  %v63_v42 = vld [vmem:[%s798_s2] sm:$0xf] }
  0x4f   :  { %590 = vmatprep.subr.bf16.mxu1 %v589_v10  ;;  %v68_v45 = vrot.slane %v63_v42, %v67_v40  ;;  %v76_v46 = vrot.slane %v63_v42, %v75_v41  ;;  %v72_v47 = vrot.slane %v63_v42, %v71_v43  ;;  %v80_v48 = vrot.slane %v63_v42, %v79_v44  ;;  %v466_v3 = vld [vmem:[%s800_s4] ss:$0 sm:$0xff] }
  0x51   :  { %560 = vmatpush3.bf16.msra.mxu0 %v559_v16 }
  0x52   :  { %592 = vmatpush3.bf16.msra.mxu1 %v591_v17  ;;  %562 = vmatprep.subr.bf16.mxu0 %v561_v18 }
  0x53   :  { %594 = vmatprep.subr.bf16.mxu1 %v593_v19 }
  0x55   :  { %564 = vmatpush3.bf16.msra.mxu0 %v563_v23 }
  0x56   :  { %596 = vmatpush3.bf16.msra.mxu1 %v595_v25  ;;  %566 = vmatprep.subr.bf16.mxu0 %v565_v29 }
  0x57   :  { %598 = vmatprep.subr.bf16.mxu1 %v597_v33 }
  0x59   :  { %568 = vmatpush3.bf16.msra.mxu0 %v567_v34 }
  0x5a   :  { %600 = vmatpush3.bf16.msra.mxu1 %v599_v37 }
 0x10d   :  { %v155_v49 = vpop.f32.mrb[0].mxu0  ;;  %v226_v50 = vpop.f32.mrb[0].mxu1 }
 0x10e   :  { %v156_v51 = vadd.f32 %v155_v49, %v68_v45  ;;  %v227_v52 = vadd.f32 %v226_v50, %v76_v46  ;;  %v157_v53 = vpop.f32.mrb[1].mxu0  ;;  %v228_v54 = vpop.f32.mrb[1].mxu1 }
 0x10f   :  { %v158_v55 = vadd.f32 %v157_v53, %v72_v47  ;;  %v229_v56 = vadd.f32 %v228_v54, %v80_v48 }
 0x110   :  { %v231_v59 = vmax.f32 %v156_v51, 0.0  ;;  %v233_v60 = vmax.f32 %v227_v52, 0.0 }
 0x111   :  { %v232_v57 = vmax.f32 %v158_v55, 0.0  ;;  %v234_v58 = vmax.f32 %v229_v56, 0.0 }
 0x113   :  { %363 = vmatprep.mubr.f32.mxu0 %v232_v57  ;;  %433 = vmatprep.mubr.f32.mxu1 %v234_v58 }
 0x114   :  { %364 = vmatmul.mubr.f32.vlgmr.msra.gmra.mrb[2].mxu0 %v231_v59  ;;  %434 = vmatmul.mubr.f32.vlgmr.msra.gmra.mrb[2].mxu1 %v233_v60 }
 0x1e7   :  { %v499_v61 = vpop.f32.mrb[2].mxu0  ;;  %v534_v62 = vpop.f32.mrb[2].mxu1 }
 0x1e8   :  { %v500_v63 = vpop.f32.mrb[3].mxu0  ;;  %v535_v0 = vpop.f32.mrb[3].mxu1 }
 0x1e9   :  { %v501_v1 = vadd.f32 %v500_v63, %v499_v61  ;;  %v536_v2 = vadd.f32 %v535_v0, %v534_v62 }
 0x1eb   :  { %v436_v4 = vadd.f32 %v536_v2, %v501_v1 }
 0x1ed   :  { %v446_v5 = vadd.f32 %v466_v3, %v436_v4 }
 0x1ef   :  { %447 = vst.msk [vmem:[#allocation8] sm:$0xff] %vm85_vm0, %v446_v5 }
 0x1f0   :  { %685 = shalt.err (!%p682_p0)
}
 0x1f1   :  { %s686_s11 = scalar_lea.hbm %s801_s5, 128 }
 0x1f2   :  { %p687_p1 = scmp.ne.s32.totalorder %s801_s5, %s686_s11  ;;  %p690_p2 = scmp.lt.u32.totalorder %s686_s11, %s801_s5 }
 0x1f4   :  { %p692_p3 = pnand %p690_p2, %p687_p1 }
 0x1f6   :  { %695 = shalt.err (!%p692_p3)
}
 0x1f7   :  { %457 = dma.vmem_to_hbm [thread:$0]  %s455_s7, 128, %s801_s5, [#allocation4]  }
 0x1f8   :  { %700 = dma.done.wait [#allocation4], 128  }
 0x1f9   :  { %701 = vsyncadd [#allocation4], 4294967168 }
 0x1fa   :  { %461 = vsyncpa [#allocation3], 1 }
 0x1fb   :  { %462 = vsyncpa [#allocation6], 1 }
 0x1fc   :  { %463 = vsyncpa [#allocation4], 1 }

</bundles_post_ra>
